<compile_context>
chip_gen: v7x
topology: tpu7x:2x2x1
jax: 0.10.0
libtpu: 0.0.40
codegen_flags: <defaults>
</compile_context>

<pallas_src>
import math

import jax
import jax.numpy as jnp
from jax.experimental import pallas as pl
from jax.experimental.pallas import tpu as pltpu

HIDDEN = 64
GROUPS = 8                      # nn.GroupNorm(64 // 8, 64)
GROUP_SIZE = HIDDEN // GROUPS   # 8 channels per group
GN_EPS = 1e-5
LOG_2PI = math.log(2.0 * math.pi)
OUT_W = 4                       # packed output lanes: 0=logp, 1=value, 2=entropy, 3=pad
TILE_Q = 16                     # batch-tile quantum (covers f32 (8) and bf16 (16) sublane packing)

_HI = jax.lax.Precision.HIGHEST


def _round_up(x, m):
    return ((x + m - 1) // m) * m


def _softplus(x):
    # numerically stable softplus (same formula in kernel and references)
    return jnp.maximum(x, 0.0) + jnp.log1p(jnp.exp(-jnp.abs(x)))


def _relu6(x):
    return jnp.clip(x, 0.0, 6.0)


def _group_mean_matrix(n, group_size=GROUP_SIZE):
    """M such that (x @ M)[:, c] = mean of x over c's group (contiguous groups)."""
    idx = jnp.arange(n) // group_size
    return (idx[:, None] == idx[None, :]).astype(jnp.float32) / float(group_size)


# ----------------------------- Pallas kernel --------------------------------

def actor_critic_kernel(scalars_ref,                 # SMEM: [action_scaling, log_std_bound]
                        s_ref, a_ref, gmat_ref,
                        w1_ref, b1_ref, w2_ref, b2_ref, wh_ref, bh_ref,
                        out_ref):
    act_dim = a_ref.shape[-1]
    scaling = scalars_ref[0]
    log_bound = scalars_ref[1]

    x = s_ref[...]                 # (Bt, obs) bf16 (cast on host; same values as in-kernel cast)
    a = a_ref[...]                 # (Bt, act) f32

    def linear_bf16(h, w_ref, b_ref):
        # bf16 operands feed the MXU; accumulate + bias in f32.
        return jnp.dot(h.astype(jnp.bfloat16), w_ref[...],
                       preferred_element_type=jnp.float32) + b_ref[...]

    def gn_relu6(hc):
        # hc is already group-mean-centered (mean subtraction folded into W/b), so the
        # biased variance is the group-mean of hc^2.  Force a single bf16 MXU pass:
        # gmat entries (0 or 1/8) are exact in bf16; statistics accumulate in f32.
        var = jnp.dot((hc * hc).astype(jnp.bfloat16), gmat_ref[...],
                      preferred_element_type=jnp.float32)
        return jnp.clip(hc * jax.lax.rsqrt(var + GN_EPS), 0.0, 6.0)

    # Fused actor||critic trunk: 128-lane activations.
    t = gn_relu6(linear_bf16(x, w1_ref, b1_ref))      # (Bt, 128)
    t = gn_relu6(linear_bf16(t, w2_ref, b2_ref))      # (Bt, 128)

    # Packed heads: [mu_pre | std_pre | value] in one matmul.
    head = linear_bf16(t, wh_ref, bh_ref)             # (Bt, 2*act + 1)

    mu = jnp.tanh(head[:, :act_dim]) * scaling
    std_pre = jnp.clip(head[:, act_dim:2 * act_dim], -log_bound, log_bound)
    std = _softplus(std_pre)
    value = head[:, 2 * act_dim:2 * act_dim + 1]      # (Bt, 1)

    # Normal(mu, std): log_prob / entropy, summed over the action dim.
    log_std = jnp.log(std)
    z = (a - mu) / std
    sls = jnp.sum(log_std, axis=-1, keepdims=True)    # reused by logp and entropy
    logp = -0.5 * jnp.sum(z * z, axis=-1, keepdims=True) - sls - (0.5 * LOG_2PI) * act_dim
    ent = sls + (0.5 + 0.5 * LOG_2PI) * act_dim

    # Direct lane-slice stores (no iota/where masking temp).
    out_ref[:, 0:1] = logp
    out_ref[:, 1:2] = value
    out_ref[:, 2:3] = ent
    out_ref[:, 3:4] = jnp.zeros_like(logp)            # keep pad lane deterministic


# ------------------------- host-side weight packing --------------------------

def pack_params(params):
    """Fold GroupNorm mean-subtraction into the linears and concatenate
    actor/critic/head weights.  All math in f32 (precision=HIGHEST)."""
    (aw1, ab1, aw2, ab2, mw, mb, sw, sb,
     cw1, cb1, cw2, cb2, cw3, cb3) = params

    def hdot(x, w):
        return jnp.dot(x, w, precision=_HI)

    C = jnp.eye(HIDDEN, dtype=jnp.float32) - _group_mean_matrix(HIDDEN)   # centering

    aw1f, ab1f = hdot(aw1, C), hdot(ab1, C)
    cw1f, cb1f = hdot(cw1, C), hdot(cb1, C)
    aw2f, ab2f = hdot(aw2, C), hdot(ab2, C)
    cw2f, cb2f = hdot(cw2, C), hdot(cb2, C)

    H2 = 2 * HIDDEN
    act_dim = mw.shape[1]
    head_w = 2 * act_dim + 1

    W1 = jnp.concatenate([aw1f, cw1f], axis=1)                 # (obs, 128)
    b1 = jnp.concatenate([ab1f, cb1f], axis=1)                 # (1, 128)

    W2 = jnp.zeros((H2, H2), jnp.float32)
    W2 = W2.at[:HIDDEN, :HIDDEN].set(aw2f).at[HIDDEN:, HIDDEN:].set(cw2f)   # block-diag
    b2 = jnp.concatenate([ab2f, cb2f], axis=1)                 # (1, 128)

    Wh = jnp.zeros((H2, head_w), jnp.float32)
    Wh = Wh.at[:HIDDEN, :act_dim].set(mw)
    Wh = Wh.at[:HIDDEN, act_dim:2 * act_dim].set(sw)
    Wh = Wh.at[HIDDEN:, 2 * act_dim:].set(cw3)
    bh = jnp.concatenate([mb, sb, cb3], axis=1)                # (1, 2*act+1)

    gmat = _group_mean_matrix(H2)                              # (128, 128)

    return dict(W1=W1, b1=b1, W2=W2, b2=b2, Wh=Wh, bh=bh, gmat=gmat)


# ------------------------------- wrapper -------------------------------------

def actor_critic_evaluate(states, actions, packed, action_scaling, b_tile=2048):
    """Returns (log_probs [B], state_value [B], dist_entropy [B])."""
    # Host-side bf16 cast of states: the kernel truncated them to bf16 at the MXU feed
    # anyway, so numerics are identical while the dominant HBM input stream halves.
    states = states.astype(jnp.bfloat16)
    actions = actions.astype(jnp.float32)
    B, obs = states.shape
    act_dim = actions.shape[1]
    head_w = 2 * act_dim + 1
    H2 = 2 * HIDDEN

    b_tile = _round_up(min(b_tile, max(B, TILE_Q)), TILE_Q)
    if B > 2 * TILE_Q and B <= b_tile:
        # Keep >= 2 grid steps so the "parallel" axis can shard across both v7x TCs.
        b_tile = _round_up((B + 1) // 2, TILE_Q)
    B_pad = _round_up(B, b_tile)
    if B_pad != B:
        states = jnp.pad(states, ((0, B_pad - B), (0, 0)))
        actions = jnp.pad(actions, ((0, B_pad - B), (0, 0)))

    # NOTE: log_std_bound = log(action_scaling); for action_scaling <= 1 the clip
    # range collapses exactly as in the original PyTorch module (kept as-is).
    scalars = jnp.array([action_scaling, math.log(action_scaling)], jnp.float32)

    # bf16 MXU operands (weights + group-mean matrix); biases / stats stay f32.
    W1 = packed["W1"].astype(jnp.bfloat16)
    W2 = packed["W2"].astype(jnp.bfloat16)
    Wh = packed["Wh"].astype(jnp.bfloat16)
    gmat = packed["gmat"].astype(jnp.bfloat16)
    b1, b2, bh = packed["b1"], packed["b2"], packed["bh"]

    grid = (B_pad // b_tile,)

    def batch_spec(last):
        return pl.BlockSpec((b_tile, last), lambda i, s: (i, 0))

    def const_spec(shape):
        return pl.BlockSpec(shape, lambda i, s: (0, 0))       # VMEM-resident

    # Explicit VMEM budget: resident weights + double-buffered input/output streams,
    # capped at 64 MiB so the same call is safe on v7x's smaller VMEM.
    bytes_resident = (gmat.size + W1.size + W2.size + Wh.size) * 2 \
                     + (b1.size + b2.size + bh.size) * 4
    bytes_streams = 2 * b_tile * (obs * 2 + act_dim * 4 + OUT_W * 4)
    vmem_limit = int(min(64 << 20, max(32 << 20, 4 * (bytes_resident + bytes_streams))))

    out = pl.pallas_call(
        actor_critic_kernel,
        out_shape=jax.ShapeDtypeStruct((B_pad, OUT_W), jnp.float32),
        grid_spec=pltpu.PrefetchScalarGridSpec(
            num_scalar_prefetch=1,
            grid=grid,
            in_specs=[
                batch_spec(obs),            # states (bf16)
                batch_spec(act_dim),        # actions (f32)
                const_spec((H2, H2)),       # group-mean matrix (bf16)
                const_spec((obs, H2)),      # W1  (actor||critic layer-1)
                const_spec((1, H2)),        # b1
                const_spec((H2, H2)),       # W2  (block-diag layer-2)
                const_spec((1, H2)),        # b2
                const_spec((H2, head_w)),   # Wh  (mu|std|value heads)
                const_spec((1, head_w)),    # bh
            ],
            out_specs=pl.BlockSpec((b_tile, OUT_W), lambda i, s: (i, 0)),
        ),
        compiler_params=pltpu.CompilerParams(
            dimension_semantics=("parallel",),
            vmem_limit_bytes=vmem_limit),
    )(scalars, states, actions, gmat, W1, b1, W2, b2, Wh, bh)

    return out[:B, 0], out[:B, 1], out[:B, 2]


# ---------------- deterministic parameter init (mirrors module __init__) -----

def _xavier_uniform(key, fan_in, fan_out):
    bound = math.sqrt(6.0 / (fan_in + fan_out))
    return jax.random.uniform(key, (fan_in, fan_out), jnp.float32, -bound, bound)


def _bias(key, n):
    return 0.01 * jax.random.normal(key, (1, n), jnp.float32)


def init_params(key, observ_dim, action_dim):
    ks = jax.random.split(key, 14)
    return [
        # Actor trunk
        _xavier_uniform(ks[0], observ_dim, HIDDEN), _bias(ks[1], HIDDEN),
        _xavier_uniform(ks[2], HIDDEN, HIDDEN),     _bias(ks[3], HIDDEN),
        # mu / log_std heads
        _xavier_uniform(ks[4], HIDDEN, action_dim), _bias(ks[5], action_dim),
        _xavier_uniform(ks[6], HIDDEN, action_dim), _bias(ks[7], action_dim),
        # Critic trunk
        _xavier_uniform(ks[8], observ_dim, HIDDEN), _bias(ks[9], HIDDEN),
        _xavier_uniform(ks[10], HIDDEN, HIDDEN),    _bias(ks[11], HIDDEN),
        _xavier_uniform(ks[12], HIDDEN, 1),         _bias(ks[13], 1),
    ]


# ---------------- pure-JAX references (for correctness checks) ---------------

def _gn_ref(x):
    xr = x.reshape(x.shape[0], GROUPS, GROUP_SIZE)
    m = xr.mean(-1, keepdims=True)
    v = ((xr - m) ** 2).mean(-1, keepdims=True)
    return ((xr - m) / jnp.sqrt(v + GN_EPS)).reshape(x.shape)


def reference_evaluate(states, actions, params, action_scaling):
    """Faithful f32 translation of the original PyTorch module."""
    (aw1, ab1, aw2, ab2, mw, mb, sw, sb,
     cw1, cb1, cw2, cb2, cw3, cb3) = params
    bound = math.log(action_scaling)

    def hdot(x, w):
        return jnp.dot(x, w, precision=_HI)

    h = _relu6(_gn_ref(hdot(states, aw1) + ab1))
    h = _relu6(_gn_ref(hdot(h, aw2) + ab2))
    mu = jnp.tanh(hdot(h, mw) + mb) * action_scaling
    std = _softplus(jnp.clip(hdot(h, sw) + sb, -bound, bound))

    c = _relu6(_gn_ref(hdot(states, cw1) + cb1))
    c = _relu6(_gn_ref(hdot(c, cw2) + cb2))
    value = (hdot(c, cw3) + cb3)[:, 0]

    log_std = jnp.log(std)
    z = (actions - mu) / std
    logp = (-0.5 * z * z - log_std - 0.5 * LOG_2PI).sum(-1)
    ent = (0.5 + 0.5 * LOG_2PI + log_std).sum(-1)
    return logp, value, ent


def packed_reference(states, actions, packed, action_scaling,
                     matmul_dtype=jnp.float32):
    """Pure-JAX mirror of the kernel math (folded / concatenated weights)."""
    bound = math.log(action_scaling)
    act_dim = actions.shape[-1]
    gmat = packed["gmat"].astype(matmul_dtype)

    def mm(x, w):
        return jnp.dot(x.astype(matmul_dtype), w.astype(matmul_dtype),
                       preferred_element_type=jnp.float32, precision=_HI)

    def gn_relu6(hc):
        var = jnp.dot((hc * hc).astype(matmul_dtype), gmat,
                      preferred_element_type=jnp.float32, precision=_HI)
        return jnp.clip(hc * jax.lax.rsqrt(var + GN_EPS), 0.0, 6.0)

    t = gn_relu6(mm(states, packed["W1"]) + packed["b1"])
    t = gn_relu6(mm(t, packed["W2"]) + packed["b2"])
    head = mm(t, packed["Wh"]) + packed["bh"]

    mu = jnp.tanh(head[:, :act_dim]) * action_scaling
    std = _softplus(jnp.clip(head[:, act_dim:2 * act_dim], -bound, bound))
    value = head[:, 2 * act_dim]

    log_std = jnp.log(std)
    z = (actions - mu) / std
    sls = log_std.sum(-1)
    logp = -0.5 * (z * z).sum(-1) - sls - 0.5 * LOG_2PI * act_dim
    ent = sls + (0.5 + 0.5 * LOG_2PI) * act_dim
    return logp, value, ent


if __name__ == "__main__":
    B, OBS, ACT = 8, 16, 4
    ACTION_SCALING = 2.0

    key = jax.random.PRNGKey(0)
    k_params, k_state, k_action = jax.random.split(key, 3)

    params = init_params(k_params, OBS, ACT)
    packed = pack_params(params)

    states = jax.random.normal(k_state, (B, OBS), jnp.float32)
    actions = jax.random.normal(k_action, (B, ACT), jnp.float32) * ACTION_SCALING

    # Run the Pallas kernel.
    logp, value, ent = actor_critic_evaluate(states, actions, packed, ACTION_SCALING)
    jax.block_until_ready((logp, value, ent))

    # Check A: the fold/concat weight transformation is mathematically identical
    # to the original module (both sides pure f32 JAX).
    a_logp, a_value, a_ent = reference_evaluate(states, actions, params, ACTION_SCALING)
    p_logp, p_value, p_ent = packed_reference(states, actions, packed, ACTION_SCALING,
                                              matmul_dtype=jnp.float32)
    assert jnp.allclose(p_logp, a_logp, atol=5e-4, rtol=5e-4)
    assert jnp.allclose(p_value, a_value, atol=5e-4, rtol=5e-4)
    assert jnp.allclose(p_ent, a_ent, atol=5e-4, rtol=5e-4)

    # Check B: the Pallas kernel matches a numerics-matched reference
    # (bf16 matmul operands incl. the GN variance matmul, f32 elementwise math).
    b_logp, b_value, b_ent = packed_reference(states, actions, packed, ACTION_SCALING,
                                              matmul_dtype=jnp.bfloat16)
    assert jnp.allclose(logp, b_logp, atol=5e-3, rtol=5e-3)
    assert jnp.allclose(value, b_value, atol=5e-3, rtol=5e-3)
    assert jnp.allclose(ent, b_ent, atol=5e-3, rtol=5e-3)

    print("KERNEL_OK")
</pallas_src>

<mosaic_0001>
module attributes {stable_mosaic.version = 11 : i64} {
  func.func @actor_critic_kernel(%arg0: i32, %arg1: memref<2xf32, #tpu.memory_space<smem>>, %arg2: memref<16x16xbf16, #tpu.memory_space<vmem>>, %arg3: memref<16x4xf32, #tpu.memory_space<vmem>>, %arg4: memref<128x128xbf16, #tpu.memory_space<vmem>>, %arg5: memref<16x128xbf16, #tpu.memory_space<vmem>>, %arg6: memref<1x128xf32, #tpu.memory_space<vmem>>, %arg7: memref<128x128xbf16, #tpu.memory_space<vmem>>, %arg8: memref<1x128xf32, #tpu.memory_space<vmem>>, %arg9: memref<128x9xbf16, #tpu.memory_space<vmem>>, %arg10: memref<1x9xf32, #tpu.memory_space<vmem>>, %arg11: memref<16x4xf32, #tpu.memory_space<vmem>>) attributes {dimension_semantics = [#tpu.dimension_semantics<parallel>], iteration_bounds = array<i64: 1>, scalar_prefetch = 1 : i64, scratch_operands = 0 : i64, tpu.core_type = #tpu.core_type<tc>, window_params = [{transform_indices = @transform_0, window_bounds = array<i64: 16, 16>}, {transform_indices = @transform_1, window_bounds = array<i64: 16, 4>}, {pipeline_mode = #tpu.pipeline_mode<synchronous>, transform_indices = @transform_2, window_bounds = array<i64: 128, 128>}, {pipeline_mode = #tpu.pipeline_mode<synchronous>, transform_indices = @transform_3, window_bounds = array<i64: 16, 128>}, {pipeline_mode = #tpu.pipeline_mode<synchronous>, transform_indices = @transform_4, window_bounds = array<i64: 1, 128>}, {pipeline_mode = #tpu.pipeline_mode<synchronous>, transform_indices = @transform_5, window_bounds = array<i64: 128, 128>}, {pipeline_mode = #tpu.pipeline_mode<synchronous>, transform_indices = @transform_6, window_bounds = array<i64: 1, 128>}, {pipeline_mode = #tpu.pipeline_mode<synchronous>, transform_indices = @transform_7, window_bounds = array<i64: 128, 9>}, {pipeline_mode = #tpu.pipeline_mode<synchronous>, transform_indices = @transform_8, window_bounds = array<i64: 1, 9>}, {transform_indices = @transform_9, window_bounds = array<i64: 16, 4>}]} {
    %c0 = arith.constant 0 : index
    %0 = memref.load %arg1[%c0] : memref<2xf32, #tpu.memory_space<smem>>
    %c1 = arith.constant 1 : index
    %1 = memref.load %arg1[%c1] : memref<2xf32, #tpu.memory_space<smem>>
    %c0_0 = arith.constant 0 : index
    %c0_1 = arith.constant 0 : index
    %2 = vector.load %arg2[%c0_0, %c0_1] : memref<16x16xbf16, #tpu.memory_space<vmem>>, vector<16x16xbf16>
    %c0_2 = arith.constant 0 : index
    %c0_3 = arith.constant 0 : index
    %3 = vector.load %arg3[%c0_2, %c0_3] : memref<16x4xf32, #tpu.memory_space<vmem>>, vector<16x4xf32>
    %c0_4 = arith.constant 0 : index
    %c0_5 = arith.constant 0 : index
    %4 = vector.load %arg5[%c0_4, %c0_5] : memref<16x128xbf16, #tpu.memory_space<vmem>>, vector<16x128xbf16>
    %cst = arith.constant dense<0.000000e+00> : vector<16x128xf32>
    %5 = tpu.matmul %2, %4, %cst {dimension_numbers = #tpu.dot_dimension_numbers<[1], [0], [0], [1], [0, 0, 1, 1], [], []>} : vector<16x16xbf16>, vector<16x128xbf16>, vector<16x128xf32> -> vector<16x128xf32>
    %c0_6 = arith.constant 0 : index
    %c0_7 = arith.constant 0 : index
    %6 = vector.load %arg6[%c0_6, %c0_7] : memref<1x128xf32, #tpu.memory_space<vmem>>, vector<1x128xf32>
    %7 = vector.broadcast %6 : vector<1x128xf32> to vector<16x128xf32>
    %8 = arith.addf %5, %7 : vector<16x128xf32>
    %9 = arith.mulf %8, %8 : vector<16x128xf32>
    %10 = arith.truncf %9 : vector<16x128xf32> to vector<16x128xbf16>
    %c0_8 = arith.constant 0 : index
    %c0_9 = arith.constant 0 : index
    %11 = vector.load %arg4[%c0_8, %c0_9] : memref<128x128xbf16, #tpu.memory_space<vmem>>, vector<128x128xbf16>
    %cst_10 = arith.constant dense<0.000000e+00> : vector<16x128xf32>
    %12 = tpu.matmul %10, %11, %cst_10 {dimension_numbers = #tpu.dot_dimension_numbers<[1], [0], [0], [1], [0, 0, 1, 1], [], []>} : vector<16x128xbf16>, vector<128x128xbf16>, vector<16x128xf32> -> vector<16x128xf32>
    %cst_11 = arith.constant 9.99999974E-6 : f32
    %13 = vector.broadcast %cst_11 : f32 to vector<16x128xf32>
    %14 = arith.addf %12, %13 : vector<16x128xf32>
    %15 = math.rsqrt %14 : vector<16x128xf32>
    %16 = arith.mulf %8, %15 : vector<16x128xf32>
    %cst_12 = arith.constant 0.000000e+00 : f32
    %cst_13 = arith.constant 6.000000e+00 : f32
    %17 = vector.broadcast %cst_12 : f32 to vector<16x128xf32>
    %18 = arith.maximumf %17, %16 : vector<16x128xf32>
    %19 = vector.broadcast %cst_13 : f32 to vector<16x128xf32>
    %20 = arith.minimumf %19, %18 : vector<16x128xf32>
    %21 = arith.truncf %20 : vector<16x128xf32> to vector<16x128xbf16>
    %c0_14 = arith.constant 0 : index
    %c0_15 = arith.constant 0 : index
    %22 = vector.load %arg7[%c0_14, %c0_15] : memref<128x128xbf16, #tpu.memory_space<vmem>>, vector<128x128xbf16>
    %cst_16 = arith.constant dense<0.000000e+00> : vector<16x128xf32>
    %23 = tpu.matmul %21, %22, %cst_16 {dimension_numbers = #tpu.dot_dimension_numbers<[1], [0], [0], [1], [0, 0, 1, 1], [], []>} : vector<16x128xbf16>, vector<128x128xbf16>, vector<16x128xf32> -> vector<16x128xf32>
    %c0_17 = arith.constant 0 : index
    %c0_18 = arith.constant 0 : index
    %24 = vector.load %arg8[%c0_17, %c0_18] : memref<1x128xf32, #tpu.memory_space<vmem>>, vector<1x128xf32>
    %25 = vector.broadcast %24 : vector<1x128xf32> to vector<16x128xf32>
    %26 = arith.addf %23, %25 : vector<16x128xf32>
    %27 = arith.mulf %26, %26 : vector<16x128xf32>
    %28 = arith.truncf %27 : vector<16x128xf32> to vector<16x128xbf16>
    %c0_19 = arith.constant 0 : index
    %c0_20 = arith.constant 0 : index
    %29 = vector.load %arg4[%c0_19, %c0_20] : memref<128x128xbf16, #tpu.memory_space<vmem>>, vector<128x128xbf16>
    %cst_21 = arith.constant dense<0.000000e+00> : vector<16x128xf32>
    %30 = tpu.matmul %28, %29, %cst_21 {dimension_numbers = #tpu.dot_dimension_numbers<[1], [0], [0], [1], [0, 0, 1, 1], [], []>} : vector<16x128xbf16>, vector<128x128xbf16>, vector<16x128xf32> -> vector<16x128xf32>
    %cst_22 = arith.constant 9.99999974E-6 : f32
    %31 = vector.broadcast %cst_22 : f32 to vector<16x128xf32>
    %32 = arith.addf %30, %31 : vector<16x128xf32>
    %33 = math.rsqrt %32 : vector<16x128xf32>
    %34 = arith.mulf %26, %33 : vector<16x128xf32>
    %cst_23 = arith.constant 0.000000e+00 : f32
    %cst_24 = arith.constant 6.000000e+00 : f32
    %35 = vector.broadcast %cst_23 : f32 to vector<16x128xf32>
    %36 = arith.maximumf %35, %34 : vector<16x128xf32>
    %37 = vector.broadcast %cst_24 : f32 to vector<16x128xf32>
    %38 = arith.minimumf %37, %36 : vector<16x128xf32>
    %39 = arith.truncf %38 : vector<16x128xf32> to vector<16x128xbf16>
    %c0_25 = arith.constant 0 : index
    %c0_26 = arith.constant 0 : index
    %40 = vector.load %arg9[%c0_25, %c0_26] : memref<128x9xbf16, #tpu.memory_space<vmem>>, vector<128x9xbf16>
    %cst_27 = arith.constant dense<0.000000e+00> : vector<16x9xf32>
    %41 = tpu.matmul %39, %40, %cst_27 {dimension_numbers = #tpu.dot_dimension_numbers<[1], [0], [0], [1], [0, 0, 1, 1], [], []>} : vector<16x128xbf16>, vector<128x9xbf16>, vector<16x9xf32> -> vector<16x9xf32>
    %c0_28 = arith.constant 0 : index
    %c0_29 = arith.constant 0 : index
    %42 = vector.load %arg10[%c0_28, %c0_29] : memref<1x9xf32, #tpu.memory_space<vmem>>, vector<1x9xf32>
    %43 = vector.broadcast %42 : vector<1x9xf32> to vector<16x9xf32>
    %44 = arith.addf %41, %43 : vector<16x9xf32>
    %45 = vector.extract_strided_slice %44 {offsets = [0, 0], sizes = [16, 4], strides = [1, 1]} : vector<16x9xf32> to vector<16x4xf32>
    %46 = math.tanh %45 : vector<16x4xf32>
    %47 = vector.broadcast %0 : f32 to vector<16x4xf32>
    %48 = arith.mulf %46, %47 : vector<16x4xf32>
    %49 = vector.extract_strided_slice %44 {offsets = [0, 4], sizes = [16, 4], strides = [1, 1]} : vector<16x9xf32> to vector<16x4xf32>
    %cst_30 = arith.constant 0.000000e+00 : f32
    %50 = arith.subf %cst_30, %1 : f32
    %51 = vector.broadcast %50 : f32 to vector<16x4xf32>
    %52 = arith.maximumf %51, %49 : vector<16x4xf32>
    %53 = vector.broadcast %1 : f32 to vector<16x4xf32>
    %54 = arith.minimumf %53, %52 : vector<16x4xf32>
    %cst_31 = arith.constant 0.000000e+00 : f32
    %55 = vector.broadcast %cst_31 : f32 to vector<16x4xf32>
    %56 = arith.maximumf %54, %55 : vector<16x4xf32>
    %57 = math.absf %54 : vector<16x4xf32>
    %cst_32 = arith.constant 0.000000e+00 : f32
    %58 = vector.broadcast %cst_32 : f32 to vector<16x4xf32>
    %59 = arith.subf %58, %57 : vector<16x4xf32>
    %60 = math.exp %59 : vector<16x4xf32>
    %61 = math.log1p %60 : vector<16x4xf32>
    %62 = arith.addf %56, %61 : vector<16x4xf32>
    %63 = vector.extract_strided_slice %44 {offsets = [0, 8], sizes = [16, 1], strides = [1, 1]} : vector<16x9xf32> to vector<16x1xf32>
    %64 = math.log %62 : vector<16x4xf32>
    %65 = arith.subf %3, %48 : vector<16x4xf32>
    %66 = arith.divf %65, %62 : vector<16x4xf32>
    %cst_33 = arith.constant dense<0.000000e+00> : vector<16xf32>
    %67 = vector.multi_reduction <add>, %64, %cst_33 [1] : vector<16x4xf32> to vector<16xf32>
    %68 = vector.shape_cast %67 : vector<16xf32> to vector<16x1xf32>
    %69 = arith.mulf %66, %66 : vector<16x4xf32>
    %cst_34 = arith.constant dense<0.000000e+00> : vector<16xf32>
    %70 = vector.multi_reduction <add>, %69, %cst_34 [1] : vector<16x4xf32> to vector<16xf32>
    %71 = vector.shape_cast %70 : vector<16xf32> to vector<16x1xf32>
    %cst_35 = arith.constant -5.000000e-01 : f32
    %72 = vector.broadcast %cst_35 : f32 to vector<16x1xf32>
    %73 = arith.mulf %72, %71 : vector<16x1xf32>
    %74 = arith.subf %73, %68 : vector<16x1xf32>
    %cst_36 = arith.constant 3.67575407 : f32
    %75 = vector.broadcast %cst_36 : f32 to vector<16x1xf32>
    %76 = arith.subf %74, %75 : vector<16x1xf32>
    %cst_37 = arith.constant 5.67575407 : f32
    %77 = vector.broadcast %cst_37 : f32 to vector<16x1xf32>
    %78 = arith.addf %68, %77 : vector<16x1xf32>
    %c0_38 = arith.constant 0 : index
    %c0_39 = arith.constant 0 : index
    %79 = vector.load %arg11[%c0_38, %c0_39] : memref<16x4xf32, #tpu.memory_space<vmem>>, vector<16x1xf32>
    tpu.vector_store %arg11[%c0_38, %c0_39], %76 {strides = array<i32>} : memref<16x4xf32, #tpu.memory_space<vmem>>, vector<16x1xf32>,
    %c0_40 = arith.constant 0 : index
    %c1_41 = arith.constant 1 : index
    %80 = vector.load %arg11[%c0_40, %c1_41] : memref<16x4xf32, #tpu.memory_space<vmem>>, vector<16x1xf32>
    tpu.vector_store %arg11[%c0_40, %c1_41], %63 {strides = array<i32>} : memref<16x4xf32, #tpu.memory_space<vmem>>, vector<16x1xf32>,
    %c0_42 = arith.constant 0 : index
    %c2 = arith.constant 2 : index
    %81 = vector.load %arg11[%c0_42, %c2] : memref<16x4xf32, #tpu.memory_space<vmem>>, vector<16x1xf32>
    tpu.vector_store %arg11[%c0_42, %c2], %78 {strides = array<i32>} : memref<16x4xf32, #tpu.memory_space<vmem>>, vector<16x1xf32>,
    %cst_43 = arith.constant 0.000000e+00 : f32
    %82 = vector.broadcast %cst_43 : f32 to vector<16x1xf32>
    %c0_44 = arith.constant 0 : index
    %c3 = arith.constant 3 : index
    %83 = vector.load %arg11[%c0_44, %c3] : memref<16x4xf32, #tpu.memory_space<vmem>>, vector<16x1xf32>
    tpu.vector_store %arg11[%c0_44, %c3], %82 {strides = array<i32>} : memref<16x4xf32, #tpu.memory_space<vmem>>, vector<16x1xf32>,
    return
  }
  func.func @transform_0(%arg0: i32, %arg1: memref<2xf32, #tpu.memory_space<smem>>) -> (i32, i32) {
    %c0_i32 = arith.constant 0 : i32
    %c0_i32_0 = arith.constant 0 : i32
    return %arg0, %c0_i32 : i32, i32
  }
  func.func @transform_1(%arg0: i32, %arg1: memref<2xf32, #tpu.memory_space<smem>>) -> (i32, i32) {
    %c0_i32 = arith.constant 0 : i32
    %c0_i32_0 = arith.constant 0 : i32
    return %arg0, %c0_i32 : i32, i32
  }
  func.func @transform_2(%arg0: i32, %arg1: memref<2xf32, #tpu.memory_space<smem>>) -> (i32, i32) {
    %c0_i32 = arith.constant 0 : i32
    %c0_i32_0 = arith.constant 0 : i32
    %c0_i32_1 = arith.constant 0 : i32
    return %c0_i32, %c0_i32_0 : i32, i32
  }
  func.func @transform_3(%arg0: i32, %arg1: memref<2xf32, #tpu.memory_space<smem>>) -> (i32, i32) {
    %c0_i32 = arith.constant 0 : i32
    %c0_i32_0 = arith.constant 0 : i32
    %c0_i32_1 = arith.constant 0 : i32
    return %c0_i32, %c0_i32_0 : i32, i32
  }
  func.func @transform_4(%arg0: i32, %arg1: memref<2xf32, #tpu.memory_space<smem>>) -> (i32, i32) {
    %c0_i32 = arith.constant 0 : i32
    %c0_i32_0 = arith.constant 0 : i32
    %c0_i32_1 = arith.constant 0 : i32
    return %c0_i32, %c0_i32_0 : i32, i32
  }
  func.func @transform_5(%arg0: i32, %arg1: memref<2xf32, #tpu.memory_space<smem>>) -> (i32, i32) {
    %c0_i32 = arith.constant 0 : i32
    %c0_i32_0 = arith.constant 0 : i32
    %c0_i32_1 = arith.constant 0 : i32
    return %c0_i32, %c0_i32_0 : i32, i32
  }
  func.func @transform_6(%arg0: i32, %arg1: memref<2xf32, #tpu.memory_space<smem>>) -> (i32, i32) {
    %c0_i32 = arith.constant 0 : i32
    %c0_i32_0 = arith.constant 0 : i32
    %c0_i32_1 = arith.constant 0 : i32
    return %c0_i32, %c0_i32_0 : i32, i32
  }
  func.func @transform_7(%arg0: i32, %arg1: memref<2xf32, #tpu.memory_space<smem>>) -> (i32, i32) {
    %c0_i32 = arith.constant 0 : i32
    %c0_i32_0 = arith.constant 0 : i32
    %c0_i32_1 = arith.constant 0 : i32
    return %c0_i32, %c0_i32_0 : i32, i32
  }
  func.func @transform_8(%arg0: i32, %arg1: memref<2xf32, #tpu.memory_space<smem>>) -> (i32, i32) {
    %c0_i32 = arith.constant 0 : i32
    %c0_i32_0 = arith.constant 0 : i32
    %c0_i32_1 = arith.constant 0 : i32
    return %c0_i32, %c0_i32_0 : i32, i32
  }
  func.func @transform_9(%arg0: i32, %arg1: memref<2xf32, #tpu.memory_space<smem>>) -> (i32, i32) {
    %c0_i32 = arith.constant 0 : i32
    %c0_i32_0 = arith.constant 0 : i32
    return %arg0, %c0_i32 : i32, i32
  }
}

</mosaic_0001>

<bundles_post_ra>
// kernel: tpu_custom_call.1
= control target key start
LH: loop header
LB: loop body
LE: loop exit
PB: predicated region body
PF: predicated region fallthrough
CT: control target
= control target key end

     0   :  { %s1122_s0 = inlined_call_operand.vmem [shape: f32[2], index: 0, kind: input, shape index: {}]   ;;  %s1123_s1 = inlined_call_operand.vmem [shape: bf16[16,16], index: 1, kind: input, shape index: {}]   ;;  %s1124_s2 = inlined_call_operand.vmem [shape: f32[16,4], index: 2, kind: input, shape index: {}]   ;;  %s1125_s3 = inlined_call_operand.vmem [shape: bf16[128,128], index: 3, kind: input, shape index: {}]   ;;  %s1126_s4 = inlined_call_operand.vmem [shape: bf16[16,128], index: 4, kind: input, shape index: {}]   ;;  %s1127_s5 = inlined_call_operand.vmem [shape: f32[1,128], index: 5, kind: input, shape index: {}]   ;;  %s1128_s6 = inlined_call_operand.hbm [shape: bf16[128,128], index: 6, kind: input, shape index: {}]   ;;  %s1129_s7 = inlined_call_operand.vmem [shape: f32[1,128], index: 7, kind: input, shape index: {}]   ;;  %s1130_s8 = inlined_call_operand.vmem [shape: bf16[128,9], index: 8, kind: input, shape index: {}]   ;;  %s1131_s9 = inlined_call_operand.vmem [shape: f32[1,9], index: 9, kind: input, shape index: {}]   ;;  %s1132_s10 = inlined_call_operand.vmem [shape: f32[16,4], index: 10, kind: output, shape index: {}]  }
   0x1   :  { %s15_s15 = sshll.u32 %s1122_s0, 4  ;;  %s16_s15 = int_to_ptr.vmem [resolvable:$true] %s15_s15 }
   0x2   :  { %s854_s16 = scalar_lea.vmem %s16_s15, 16  ;;  %p859_p1 = scmp.lt.s32.totalorder %s16_s15, %s16_s15 }
   0x3   :  { %p855_p0 = scmp.ne.s32.totalorder %s16_s15, %s854_s16  ;;  %p860_p2 = scmp.lt.s32.totalorder %s854_s16, %s854_s16 }
   0x5   :  { %p861_p3 = por %p860_p2, %p859_p1 }
   0x7   :  { %p862_p4 = pnand %p861_p3, %p855_p0 }
   0x9   :  { %865 = shalt.err (!%p862_p4)  }
   0xa   :  { %s892_s17 = smov [#allocation3]  }
   0xb   :  { %18 = dma.vmem_to_smem %s16_s15, 16, %s892_s17, [#allocation2] }
   0xc   :  { %888 = dma.done.wait [#allocation2], 16 }
   0xd   :  { %889 = vsyncadd [#allocation2], 4294967280 }
   0xe   :  { %20 = sfence }
   0xf   :  { %21 = vsyncpa [#allocation5], 0  ;;  %s893_s18 = smov [#allocation4]   ;;  %s866_s0 = scalar_lea.hbm %s1128_s6, 1024 }
  0x10   :  { %s37_s19 = sshll.u32 %s893_s18, 4  ;;  %p867_p5 = scmp.ne.s32.totalorder %s1128_s6, %s866_s0  ;;  %s38_s19 = int_to_ptr.vmem [resolvable:$true] %s37_s19 }
  0x11   :  { %p870_p6 = scmp.lt.u32.totalorder %s866_s0, %s1128_s6 }
  0x13   :  { %p872_p7 = pnand %p870_p6, %p867_p5 }
  0x15   :  { %875 = shalt.err (!%p872_p7)
}
  0x16   :  { %s876_s26 = scalar_lea.vmem %s38_s19, 1024  ;;  %p881_p9 = scmp.lt.s32.totalorder %s38_s19, %s38_s19 }
  0x17   :  { %p877_p8 = scmp.ne.s32.totalorder %s38_s19, %s876_s26  ;;  %p882_p10 = scmp.lt.s32.totalorder %s876_s26, %s876_s26 }
  0x19   :  { %p883_p11 = por %p882_p10, %p881_p9 }
  0x1b   :  { %p884_p12 = pnand %p883_p11, %p877_p8 }
  0x1d   :  { %887 = shalt.err (!%p884_p12)
}
  0x1e   :  { %s894_s27 = smov 64   ;;  %s895_s28 = smov 4  }
  0x1f   :  { %43 = dma.hbm_to_vmem [thread:$0]  %s1128_s6, 1024, %s38_s19, [#allocation5], %s894_s27, %s894_s27, %s895_s28  }
  0x20   :  { %890 = dma.done.wait [#allocation5], 1024  }
  0x21   :  { %891 = vsyncadd [#allocation5], 4294966272  ;;  %v896_v0 = vmov 0.0   ;;  %vm897_vm0 = vmmov 0   ;;  %v800_v1 = vld [vmem:[%s1126_s4] sm:$0xff]   ;;  %vm80_vm1 = vcmask 130048  }
  0x22   :  { %706 = vmatprep.subr.bf16.mxu0 %v896_v0  ;;  %708 = vmatprep.mubr.msk.bf16.mxu0 %vm897_vm0, %v896_v0  ;;  %v801_v2 = vld [vmem:[%s1123_s1] sm:$0xff]   ;;  %v803_v4 = vld [vmem:[%s1125_s3 + $0x8] sm:$0xff]   ;;  %v804_v5 = vld [vmem:[%s1125_s3 + $0x10] sm:$0xff]   ;;  %s54_s23 = sld [smem:[#allocation3]]  ;;  %vm587_vm4 = vcmask 31744   ;;  %vm610_vm5 = vcmask 7168  }
  0x23   :  { %712 = vmatprep.subr.bf16.mxu1 %v896_v0  ;;  %728 = vmatprep.mubr.msk.bf16.mxu1 %vm897_vm0, %v896_v0  ;;  %v802_v3 = vld [vmem:[%s1125_s3] sm:$0xff]   ;;  %v805_v6 = vld [vmem:[%s1125_s3 + $0x18] sm:$0xff]   ;;  %v807_v8 = vld [vmem:[%s1125_s3 + $0x28] sm:$0xff]   ;;  %vm621_vm6 = vcmask 15368   ;;  %vm624_vm7 = vcmask 23568   ;;  %vm627_vm8 = vcmask 31768  }
  0x24   :  { %707 = vmatpush3.bf16.msra.mxu0 %v800_v1  ;;  %713 = vmatpush3.bf16.msra.mxu1 %v802_v3  ;;  %v806_v7 = vld [vmem:[%s1125_s3 + $0x20] sm:$0xff]   ;;  %v808_v9 = vld [vmem:[%s1125_s3 + $0x30] sm:$0xff]   ;;  %v809_v10 = vld [vmem:[%s1125_s3 + $0x38] sm:$0xff]  }
  0x25   :  { %732 = vmatprep.subr.bf16.mxu0 %v896_v0  ;;  %714 = vmatprep.subr.bf16.mxu1 %v896_v0  ;;  %v810_v11 = vld [vmem:[#allocation4] sm:$0xff]   ;;  %v811_v12 = vld [vmem:[#allocation4 + $0x8] sm:$0xff]   ;;  %v812_v23 = vld [vmem:[#allocation4 + $0x10] sm:$0xff]  }
  0x26   :  { %v636_v13 = vld [vmem:[%s1127_s5] ss:$0 sm:$0xff]  ;;  %v813_v24 = vld [vmem:[#allocation4 + $0x18] sm:$0xff]   ;;  %v815_v26 = vld [vmem:[#allocation4 + $0x28] sm:$0xff]  }
  0x27   :  { %709 = vmatmul.mubr.msk.bf16.vlgmr.msra.gmra.mrb[0].mxu0 %vm80_vm1, %v801_v2  ;;  %v814_v25 = vld [vmem:[#allocation4 + $0x20] sm:$0xff]   ;;  %v816_v27 = vld [vmem:[#allocation4 + $0x30] sm:$0xff]   ;;  %v817_v28 = vld [vmem:[#allocation4 + $0x38] sm:$0xff]  }
  0x28   :  { %748 = vmatprep.mubr.msk.bf16.mxu0 %vm897_vm0, %v896_v0  ;;  %715 = vmatpush3.bf16.msra.mxu1 %v803_v4  ;;  %v818_v44 = vld [vmem:[%s1130_s8] sm:$0xff]   ;;  %v819_v45 = vld [vmem:[%s1130_s8 + $0x8] sm:$0xff]   ;;  %v820_v56 = vld [vmem:[%s1130_s8 + $0x10] sm:$0xff]  }
  0x29   :  { %716 = vmatprep.subr.bf16.mxu1 %v896_v0  ;;  %733 = vmatpush3.bf16.msra.mxu0 %v810_v11  ;;  %v648_v46 = vld [vmem:[%s1129_s7] ss:$0 sm:$0xff]  ;;  %v821_v57 = vld [vmem:[%s1130_s8 + $0x18] sm:$0xff]   ;;  %v823_v59 = vld [vmem:[%s1130_s8 + $0x28] sm:$0xff]  }
  0x2a   :  { %734 = vmatprep.subr.bf16.mxu0 %v896_v0  ;;  %v822_v58 = vld [vmem:[%s1130_s8 + $0x20] sm:$0xff]   ;;  %v824_v60 = vld [vmem:[%s1130_s8 + $0x30] sm:$0xff]   ;;  %v825_v61 = vld [vmem:[%s1130_s8 + $0x38] sm:$0xff]   ;;  %s635_s8 = sld [smem:[#allocation3 + $0x1]] }
  0x2c   :  { %717 = vmatpush3.bf16.msra.mxu1 %v804_v5 }
  0x2d   :  { %718 = vmatprep.subr.bf16.mxu1 %v896_v0  ;;  %735 = vmatpush3.bf16.msra.mxu0 %v811_v12 }
  0x2e   :  { %736 = vmatprep.subr.bf16.mxu0 %v896_v0 }
  0x30   :  { %719 = vmatpush3.bf16.msra.mxu1 %v805_v6  ;;  %s524_s21 = ssub.f32 0.0, %s635_s8 }
  0x31   :  { %720 = vmatprep.subr.bf16.mxu1 %v896_v0  ;;  %737 = vmatpush3.bf16.msra.mxu0 %v812_v23 }
  0x32   :  { %738 = vmatprep.subr.bf16.mxu0 %v896_v0 }
  0x34   :  { %721 = vmatpush3.bf16.msra.mxu1 %v806_v7 }
  0x35   :  { %722 = vmatprep.subr.bf16.mxu1 %v896_v0  ;;  %739 = vmatpush3.bf16.msra.mxu0 %v813_v24 }
  0x36   :  { %740 = vmatprep.subr.bf16.mxu0 %v896_v0 }
  0x38   :  { %723 = vmatpush3.bf16.msra.mxu1 %v807_v8 }
  0x39   :  { %724 = vmatprep.subr.bf16.mxu1 %v896_v0  ;;  %741 = vmatpush3.bf16.msra.mxu0 %v814_v25 }
  0x3a   :  { %742 = vmatprep.subr.bf16.mxu0 %v896_v0 }
  0x3c   :  { %725 = vmatpush3.bf16.msra.mxu1 %v808_v9 }
  0x3d   :  { %726 = vmatprep.subr.bf16.mxu1 %v896_v0  ;;  %743 = vmatpush3.bf16.msra.mxu0 %v815_v26 }
  0x3e   :  { %744 = vmatprep.subr.bf16.mxu0 %v896_v0 }
  0x40   :  { %727 = vmatpush3.bf16.msra.mxu1 %v809_v10 }
  0x41   :  { %752 = vmatprep.subr.bf16.mxu1 %v896_v0  ;;  %745 = vmatpush3.bf16.msra.mxu0 %v816_v27 }
  0x42   :  { %746 = vmatprep.subr.bf16.mxu0 %v896_v0 }
  0x45   :  { %747 = vmatpush3.bf16.msra.mxu0 %v817_v28 }
  0x46   :  { %772 = vmatprep.subr.bf16.mxu0 %v896_v0 }
  0xfa   :  { %v118_v14 = vpop.f32.mrb[0].mxu0 }
  0xfb   :  { %v119_v15 = vadd.f32 %v636_v13, %v118_v14  ;;  %v710_v16 = vpop.f32.mrb[1].mxu0  ;;  %v657_v14 = vld [vmem:[%s1131_s9] ss:$0 sm:$0xff]  ;;  %s898_s9 = smov 124  }
  0xfc   :  { %v121_v17 = vpop.f32.mrb[2].mxu0  ;;  %v525_v16 = vstv %s524_s21 }
  0xfd   :  { %v122_v18 = vadd.f32 %v636_v13, %v121_v17  ;;  %v711_v19 = vpop.f32.mrb[3].mxu0  ;;  %v125_v20 = vmul.f32 %v119_v15, %v119_v15 }
  0xff   :  { %v126_v21 = vmul.f32 %v122_v18, %v122_v18 }
 0x101   :  { %v127_v22 = vpack.c.bf16 %v126_v21, %v125_v20  ;;  %v528_v20 = vstv %s635_s8 }
 0x103   :  { %729 = vmatmul.mubr.bf16.vlgmr.msra.gmra.mrb[0].mxu1 %v127_v22 }
 0x104   :  { %753 = vmatpush3.bf16.msra.mxu1 %v802_v3  ;;  %768 = vmatprep.mubr.msk.bf16.mxu1 %vm897_vm0, %v896_v0 }
 0x105   :  { %754 = vmatprep.subr.bf16.mxu1 %v896_v0 }
 0x108   :  { %755 = vmatpush3.bf16.msra.mxu1 %v803_v4 }
 0x109   :  { %756 = vmatprep.subr.bf16.mxu1 %v896_v0 }
 0x10c   :  { %757 = vmatpush3.bf16.msra.mxu1 %v804_v5 }
 0x10d   :  { %758 = vmatprep.subr.bf16.mxu1 %v896_v0 }
 0x110   :  { %759 = vmatpush3.bf16.msra.mxu1 %v805_v6 }
 0x111   :  { %760 = vmatprep.subr.bf16.mxu1 %v896_v0 }
 0x114   :  { %761 = vmatpush3.bf16.msra.mxu1 %v806_v7 }
 0x115   :  { %762 = vmatprep.subr.bf16.mxu1 %v896_v0 }
 0x118   :  { %763 = vmatpush3.bf16.msra.mxu1 %v807_v8 }
 0x119   :  { %764 = vmatprep.subr.bf16.mxu1 %v896_v0 }
 0x11c   :  { %765 = vmatpush3.bf16.msra.mxu1 %v808_v9 }
 0x11d   :  { %766 = vmatprep.subr.bf16.mxu1 %v896_v0 }
 0x120   :  { %767 = vmatpush3.bf16.msra.mxu1 %v809_v10 }
 0x1d6   :  { %v226_v29 = vpop.f32.mrb[0].mxu1 }
 0x1d7   :  { %v227_v30 = vadd.f32 1e-05, %v226_v29  ;;  %v730_v31 = vpop.f32.mrb[1].mxu1 }
 0x1d8   :  { %v229_v32 = vpop.f32.mrb[2].mxu1 }
 0x1d9   :  { %826 = vrsqrt.f32 %v227_v30  ;;  %v230_v33 = vadd.f32 1e-05, %v229_v32  ;;  %v731_v34 = vpop.f32.mrb[3].mxu1 }
 0x1db   :  { %828 = vrsqrt.f32 %v230_v33 }
 0x1e3   :  { %v827_v35 = vpop.eup %826 }
 0x1e4   :  { %v235_v36 = vmul.f32 %v827_v35, %v119_v15 }
 0x1e5   :  { %v829_v37 = vpop.eup %828 }
 0x1e6   :  { %v236_v38 = vmul.f32 %v829_v37, %v122_v18  ;;  %v237_v39 = vmax.f32 %v235_v36, 0.0 }
 0x1e8   :  { %v238_v40 = vmax.f32 %v236_v38, 0.0  ;;  %v239_v41 = vmin.f32 %v237_v39, 6.0 }
 0x1ea   :  { %v240_v42 = vmin.f32 %v238_v40, 6.0 }
 0x1ec   :  { %v241_v43 = vpack.c.bf16 %v240_v42, %v239_v41 }
 0x1ee   :  { %749 = vmatmul.mubr.bf16.vlgmr.msra.gmra.mrb[4].mxu0 %v241_v43 }
 0x1ef   :  { %788 = vmatprep.mubr.msk.bf16.mxu0 %vm897_vm0, %v896_v0  ;;  %773 = vmatpush3.bf16.msra.mxu0 %v818_v44 }
 0x1f0   :  { %774 = vmatprep.subr.bf16.mxu0 %v896_v0 }
 0x1f3   :  { %775 = vmatpush3.bf16.msra.mxu0 %v819_v45 }
 0x1f4   :  { %776 = vmatprep.subr.bf16.mxu0 %v896_v0 }
 0x1f7   :  { %777 = vmatpush3.bf16.msra.mxu0 %v820_v56 }
 0x1f8   :  { %778 = vmatprep.subr.bf16.mxu0 %v896_v0 }
 0x1fb   :  { %779 = vmatpush3.bf16.msra.mxu0 %v821_v57 }
 0x1fc   :  { %780 = vmatprep.subr.bf16.mxu0 %v896_v0 }
 0x1ff   :  { %781 = vmatpush3.bf16.msra.mxu0 %v822_v58 }
 0x200   :  { %782 = vmatprep.subr.bf16.mxu0 %v896_v0 }
 0x203   :  { %783 = vmatpush3.bf16.msra.mxu0 %v823_v59 }
 0x204   :  { %784 = vmatprep.subr.bf16.mxu0 %v896_v0 }
 0x207   :  { %785 = vmatpush3.bf16.msra.mxu0 %v824_v60 }
 0x208   :  { %786 = vmatprep.subr.bf16.mxu0 %v896_v0 }
 0x20b   :  { %787 = vmatpush3.bf16.msra.mxu0 %v825_v61  ;;  %v521_v61 = vstv %s54_s23 }
 0x2c1   :  { %v347_v47 = vpop.f32.mrb[4].mxu0 }
 0x2c2   :  { %v348_v48 = vadd.f32 %v648_v46, %v347_v47  ;;  %v750_v49 = vpop.f32.mrb[5].mxu0 }
 0x2c3   :  { %v350_v50 = vpop.f32.mrb[6].mxu0 }
 0x2c4   :  { %v351_v51 = vadd.f32 %v648_v46, %v350_v50  ;;  %v751_v52 = vpop.f32.mrb[7].mxu0  ;;  %v354_v53 = vmul.f32 %v348_v48, %v348_v48 }
 0x2c6   :  { %v355_v54 = vmul.f32 %v351_v51, %v351_v51 }
 0x2c8   :  { %v356_v55 = vpack.c.bf16 %v355_v54, %v354_v53 }
 0x2ca   :  { %769 = vmatmul.mubr.bf16.vlgmr.msra.gmra.mrb[4].mxu1 %v356_v55 }
 0x39d   :  { %v391_v62 = vpop.f32.mrb[4].mxu1 }
 0x39e   :  { %v392_v63 = vadd.f32 1e-05, %v391_v62  ;;  %v770_v1 = vpop.f32.mrb[5].mxu1 }
 0x39f   :  { %v394_v2 = vpop.f32.mrb[6].mxu1 }
 0x3a0   :  { %830 = vrsqrt.f32 %v392_v63  ;;  %v395_v3 = vadd.f32 1e-05, %v394_v2  ;;  %v771_v4 = vpop.f32.mrb[7].mxu1  ;;  %v58_v2 = vld [vmem:[%s1124_s2] sm:$0xff] }
 0x3a2   :  { %832 = vrsqrt.f32 %v395_v3 }
 0x3aa   :  { %v831_v5 = vpop.eup %830 }
 0x3ab   :  { %v400_v6 = vmul.f32 %v831_v5, %v348_v48 }
 0x3ac   :  { %v833_v7 = vpop.eup %832 }
 0x3ad   :  { %v401_v8 = vmul.f32 %v833_v7, %v351_v51  ;;  %v402_v9 = vmax.f32 %v400_v6, 0.0  ;;  %v59_v6 = vld [vmem:[%s1124_s2 + $0x8] sm:$0xff]  ;;  %s899_s2 = smov 121  }
 0x3af   :  { %v403_v10 = vmax.f32 %v401_v8, 0.0  ;;  %v404_v11 = vmin.f32 %v402_v9, 6.0 }
 0x3b1   :  { %v405_v12 = vmin.f32 %v403_v10, 6.0 }
 0x3b3   :  { %v406_v13 = vpack.c.bf16 %v405_v12, %v404_v11 }
 0x3b5   :  { %789 = vmatmul.mubr.bf16.vlgmr.msra.gmra.mrb[8].mxu0 %v406_v13 }
 0x488   :  { %v512_v15 = vpop.f32.mrb[8].mxu0 }
 0x489   :  { %v1076_v17 = vadd.f32 %v657_v14, %v512_v15  ;;  %v790_v18 = vpop.f32.mrb[9].mxu0 }
 0x48a   :  { %v515_v19 = vpop.f32.mrb[10].mxu0 }
 0x48b   :  { %v526_v21 = vmax.f32 %v525_v16, %v1076_v17  ;;  %v1079_v22 = vadd.f32 %v657_v14, %v515_v19  ;;  %v791_v23 = vpop.f32.mrb[11].mxu0 }
 0x48d   :  { %v527_v24 = vmax.f32 %v525_v16, %v1079_v22  ;;  %v529_v25 = vmin.f32 %v528_v20, %v526_v21 }
 0x48f   :  { %v530_v26 = vmin.f32 %v528_v20, %v527_v24  ;;  %v533_v27 = vand.u32 2147483647, %v529_v25  ;;  %v531_v47 = vmax.f32 %v529_v25, 0.0 }
 0x491   :  { %v534_v28 = vand.u32 2147483647, %v530_v26  ;;  %v535_v29 = vsub.f32 0.0, %v533_v27  ;;  %v532_v52 = vmax.f32 %v530_v26, 0.0 }
 0x493   :  { %v536_v30 = vsub.f32 0.0, %v534_v28  ;;  %v537_v31 = vmul.f32 1.442695, %v535_v29 }
 0x495   :  { %834 = vpow2.f32 %v537_v31  ;;  %v539_v32 = vmul.f32 1.442695, %v536_v30 }
 0x497   :  { %836 = vpow2.f32 %v539_v32 }
 0x49f   :  { %v835_v33 = vpop.eup %834 }
 0x4a0   :  { %v541_v34 = vadd.f32 1.0, %v835_v33  ;;  %v544_v37 = vmul.f32 -0.5, %v835_v33  ;;  %v547_v40 = vand.u32 2147483647, %v835_v33 }
 0x4a1   :  { %v837_v35 = vpop.eup %836 }
 0x4a2   :  { %838 = vlog2.f32 %v541_v34  ;;  %v550_v36 = vadd.f32 1.0, %v837_v35  ;;  %v553_v38 = vmul.f32 -0.5, %v837_v35  ;;  %v545_v39 = vadd.f32 1.0, %v544_v37 }
 0x4a3   :  { %v556_v43 = vand.u32 2147483647, %v837_v35  ;;  %vm548_vm2 = vcmp.lt.f32.partialorder %v547_v40, 0.0004427343 }
 0x4a4   :  { %840 = vlog2.f32 %v550_v36  ;;  %v554_v41 = vadd.f32 1.0, %v553_v38  ;;  %v546_v45 = vmul.f32 %v835_v33, %v545_v39 }
 0x4a5   :  { %vm557_vm3 = vcmp.lt.f32.partialorder %v556_v43, 0.0004427343 }
 0x4a6   :  { %v555_v50 = vmul.f32 %v837_v35, %v554_v41 }
 0x4ac   :  { %v839_v42 = vpop.eup %838 }
 0x4ad   :  { %v543_v44 = vmul.f32 0.6931472, %v839_v42 }
 0x4ae   :  { %v841_v46 = vpop.eup %840 }
 0x4af   :  { %v549_v48 = vsel %vm548_vm2, %v546_v45, %v543_v44  ;;  %v552_v49 = vmul.f32 0.6931472, %v841_v46 }
 0x4b0   :  { %v559_v51 = vadd.f32 %v549_v48, %v531_v47 }
 0x4b1   :  { %v558_v53 = vsel %vm557_vm3, %v555_v50, %v552_v49 }
 0x4b2   :  { %569 = vrot.lane.b32.xlu0 %v559_v51, %s898_s9  ;;  %842 = vlog2.f32 %v559_v51  ;;  %v560_v54 = vadd.f32 %v558_v53, %v532_v52 }
 0x4b4   :  { %844 = vlog2.f32 %v560_v54 }
 0x4b5   :  { %846 = vtanh.f32 %v1076_v17 }
 0x4b6   :  { %571 = vrot.lane.b32.xlu0 %v560_v54, %s898_s9  ;;  %848 = vtanh.f32 %v1079_v22 }
 0x4bc   :  { %v843_v55 = vpop.eup %842 }
 0x4bd   :  { %v562_v56 = vmul.f32 0.6931472, %v843_v55 }
 0x4be   :  { %v845_v57 = vpop.eup %844 }
 0x4bf   :  { %581 = vrot.lane.b32.xlu1 %v562_v56, %s898_s9  ;;  %v564_v58 = vmul.f32 0.6931472, %v845_v57  ;;  %v847_v60 = vpop.eup %846 }
 0x4c0   :  { %v522_v63 = vmul.f32 %v847_v60, %v521_v61  ;;  %v849_v1 = vpop.eup %848 }
 0x4c1   :  { %v523_v4 = vmul.f32 %v849_v1, %v521_v61 }
 0x4c2   :  { %v565_v3 = vsub.f32 %v58_v2, %v522_v63 }
 0x4c3   :  { %583 = vrot.lane.b32.xlu1 %v564_v58, %s898_s9  ;;  %v566_v11 = vsub.f32 %v59_v6, %v523_v4 }
 0x524   :  { %v570_v59 = vpop.permute.xlu0 %569 }
 0x525   :  { %850 = vrcp.f32 %v570_v59 }
 0x528   :  { %v572_v62 = vpop.permute.xlu0 %571 }
 0x529   :  { %852 = vrcp.f32 %v572_v62 }
 0x52f   :  { %v851_v5 = vpop.eup %850 }
 0x530   :  { %v576_v7 = vmul.f32 %v851_v5, %v565_v3 }
 0x531   :  { %v582_v8 = vpop.permute.xlu1 %581 }
 0x532   :  { %v588_v9 = vsel %vm587_vm4, %v582_v8, 0.0  ;;  %v594_v10 = vmul.f32 %v576_v7, %v576_v7 }
 0x533   :  { %v853_v12 = vpop.eup %852  ;;  %589 = vadd.xlane.f32.xlu0 %v588_v9 }
 0x534   :  { %v578_v13 = vmul.f32 %v853_v12, %v566_v11  ;;  %v596_v14 = vsel %vm587_vm4, %v594_v10, 0.0 }
 0x535   :  { %v584_v16 = vpop.permute.xlu1 %583 }
 0x536   :  { %v595_v15 = vmul.f32 %v578_v13, %v578_v13  ;;  %v591_v19 = vsel %vm587_vm4, %v584_v16, 0.0 }
 0x537   :  { %597 = vadd.xlane.f32.xlu0 %v596_v14 }
 0x538   :  { %v599_v18 = vsel %vm587_vm4, %v595_v15, 0.0 }
 0x539   :  { %600 = vadd.xlane.f32.xlu1 %v599_v18 }
 0x53b   :  { %592 = vadd.xlane.f32.xlu0 %v591_v19 }
 0x54a   :  { %615 = vrot.lane.b32.xlu1 %v1076_v17, %s899_s2 }
 0x551   :  { %617 = vrot.lane.b32.xlu0 %v1079_v22, %s899_s2 }
 0x5c0   :  { %v590_v20 = vpop.xlane.xlu0 %589 }
 0x5c1   :  { %v608_v31 = vadd.f32 5.675754, %v590_v20 }
 0x5c4   :  { %v598_v21 = vpop.xlane.xlu0 %597 }
 0x5c5   :  { %v602_v23 = vmul.f32 -0.5, %v598_v21 }
 0x5c6   :  { %v601_v24 = vpop.xlane.xlu1 %600 }
 0x5c7   :  { %v604_v25 = vsub.f32 %v602_v23, %v590_v20  ;;  %v603_v26 = vmul.f32 -0.5, %v601_v24 }
 0x5c8   :  { %v593_v27 = vpop.xlane.xlu0 %592 }
 0x5c9   :  { %v666_v28 = vadd.f32 -3.675754, %v604_v25  ;;  %v605_v29 = vsub.f32 %v603_v26, %v593_v27  ;;  %v609_v22 = vadd.f32 5.675754, %v593_v27 }
 0x5ca   :  { %v616_v30 = vpop.permute.xlu1 %615 }
 0x5cb   :  { %v667_v32 = vadd.f32 -3.675754, %v605_v29  ;;  %611 = vst.msk [vmem:[%s1132_s10] sm:$0xff] %vm610_vm5, %v666_v28 }
 0x5cc   :  { %622 = vst.msk [vmem:[%s1132_s10] sm:$0xff] %vm621_vm6, %v616_v30  ;;  %v618_v17 = vpop.permute.xlu0 %617 }
 0x5cd   :  { %612 = vst.msk [vmem:[%s1132_s10 + $0x8] sm:$0xff] %vm610_vm5, %v667_v32 }
 0x5ce   :  { %625 = vst.msk [vmem:[%s1132_s10] sm:$0xff] %vm624_vm7, %v608_v31 }
 0x5cf   :  { %628 = vst.msk [vmem:[%s1132_s10] sm:$0xff] %vm627_vm8, %v896_v0 }
 0x5d0   :  { %623 = vst.msk [vmem:[%s1132_s10 + $0x8] sm:$0xff] %vm621_vm6, %v618_v17 }
 0x5d1   :  { %626 = vst.msk [vmem:[%s1132_s10 + $0x8] sm:$0xff] %vm624_vm7, %v609_v22 }
 0x5d2   :  { %629 = vst.msk [vmem:[%s1132_s10 + $0x8] sm:$0xff] %vm627_vm8, %v896_v0 }
 0x5d3   :  { %634 = vsyncpa [#allocation5], 1 }

</bundles_post_ra>
